<compile_context>
chip_gen: v7x
topology: tpu7x:2x2x1
jax: 0.10.0
libtpu: 0.0.40
codegen_flags: <defaults>
</compile_context>

<pallas_src>
import math

import jax
import jax.numpy as jnp
from jax.experimental import pallas as pl
from jax.experimental.pallas import tpu as pltpu


def _round_up(a: int, b: int) -> int:
    return (a + b - 1) // b * b


def _cdiv(a: int, b: int) -> int:
    return (a + b - 1) // b


def _sublane_multiple(dtype) -> int:
    # Native sublane granule: f32 -> 8, bf16/fp16 -> 16, int8/fp8 -> 32.
    return max(8, 32 // jnp.dtype(dtype).itemsize)


def _drop_path_kernel(scale_ref, x_ref, o_ref):
    # scale_ref: (TR, 1) f32 per-row scale in {0, 1/keep_prob}
    # x_ref / o_ref: (TR, LANES) tiles of the (row-major) flattened input
    o_ref[...] = (x_ref[...] * scale_ref[...]).astype(o_ref.dtype)


def _per_sample_scale(key, batch, keep_prob):
    # floor(keep_prob + U[0,1)) in {0,1}, scaled by 1/keep_prob (torch trick).
    u = jax.random.uniform(key, (batch,), dtype=jnp.float32)
    return jnp.floor(jnp.float32(keep_prob) + u) * jnp.float32(1.0 / keep_prob)


_SMALL_INPUT_BYTES = 1 << 20  # below this, a fused XLA broadcast-mul wins


def drop_path_pallas(x, key, drop_prob=0.0, training=False, *, force_pallas=False):
    """Matches torch drop_path semantics: per-sample binary mask, surviving
    samples scaled by 1/keep_prob."""
    if drop_prob == 0.0 or not training:
        return x

    keep_prob = 1.0 - drop_prob
    B = x.shape[0]
    N = math.prod(x.shape[1:])
    itemsize = jnp.dtype(x.dtype).itemsize

    scale = _per_sample_scale(key, B, keep_prob)

    # Fast path: tiny inputs (or lane-waste shapes) go through plain XLA.
    if not force_pallas and (N < 128 or x.size * itemsize < _SMALL_INPUT_BYTES):
        bshape = (B,) + (1,) * (x.ndim - 1)
        return (x * scale.reshape(bshape)).astype(x.dtype)

    # --- lane-dense layout ----------------------------------------------------
    # Prefer a lane width (multiple of 128, <= 2048) that divides N exactly so
    # the reshape is a free view; only pad when N % 128 != 0.
    if N % 128 == 0:
        lanes = 128
        for cand in range((min(N, 2048) // 128) * 128, 0, -128):
            if N % cand == 0:
                lanes = cand
                break
        n_pad = N
    else:
        lanes = 512 if N >= 512 else _round_up(N, 128)
        n_pad = _round_up(N, lanes)
    rows_per_sample = n_pad // lanes
    total_rows = B * rows_per_sample

    # --- row (sublane) block sizing --------------------------------------------
    s = _sublane_multiple(x.dtype)
    target_block_bytes = 4 * 1024 * 1024  # ~16 MiB double-buffered in+out
    max_tr = max(s, (target_block_bytes // (lanes * itemsize)) // s * s)
    if total_rows > max_tr:
        tr = max_tr
    elif total_rows >= 2 * s:
        # Split rows into >= 2 grid steps so both v7x TensorCores get work.
        tr = _round_up(_cdiv(total_rows, 2), s)
    else:
        tr = total_rows  # single full-dim block (tiny input forced to Pallas)
    grid = _cdiv(total_rows, tr)  # partial edge block is masked by Pallas

    xf = x.reshape(B, N)
    if n_pad != N:
        xf = jnp.pad(xf, ((0, 0), (0, n_pad - N)))
    xr = xf.reshape(total_rows, lanes)

    scale_rows = jnp.repeat(scale, rows_per_sample).reshape(total_rows, 1)

    out = pl.pallas_call(
        _drop_path_kernel,
        out_shape=jax.ShapeDtypeStruct((total_rows, lanes), x.dtype),
        grid=(grid,),
        in_specs=[
            pl.BlockSpec((tr, 1), lambda i: (i, 0)),
            pl.BlockSpec((tr, lanes), lambda i: (i, 0)),
        ],
        out_specs=pl.BlockSpec((tr, lanes), lambda i: (i, 0)),
        compiler_params=pltpu.CompilerParams(
            dimension_semantics=("parallel",),
            vmem_limit_bytes=40 * 1024 * 1024,
        ),
    )(scale_rows, xr)

    if n_pad != N:
        out = out.reshape(B, n_pad)[:, :N]
    return out.reshape(x.shape)


class DropPath:
    """JAX/Pallas port of the PyTorch DropPath module (forward pass)."""

    def __init__(self, drop_prob=None):
        self.drop_prob = 0.0 if drop_prob is None else float(drop_prob)
        self.training = True

    def __call__(self, x, key, *, force_pallas=False):
        return drop_path_pallas(x, key, self.drop_prob, self.training,
                                force_pallas=force_pallas)


def _reference(x, key, drop_prob):
    keep_prob = 1.0 - drop_prob
    scale = _per_sample_scale(key, x.shape[0], keep_prob)
    bshape = (x.shape[0],) + (1,) * (x.ndim - 1)
    return (x.astype(jnp.float32) * scale.reshape(bshape)).astype(x.dtype)


if __name__ == "__main__":
    key = jax.random.PRNGKey(0)
    k_x1, k_m1, k_x2, k_m2, k_x3, k_m3 = jax.random.split(key, 6)
    drop_prob = 0.3

    # --- test 1: module-implied NCHW shape, f32, Pallas path (lanes divide N) --
    B, C, H, W = 2, 4, 16, 16
    x1 = jax.random.normal(k_x1, (B, C, H, W), dtype=jnp.float32)
    out1 = jax.block_until_ready(
        drop_path_pallas(x1, k_m1, drop_prob, True, force_pallas=True))
    ref1 = _reference(x1, k_m1, drop_prob)
    assert out1.shape == x1.shape and out1.dtype == x1.dtype
    assert jnp.allclose(out1, ref1, atol=1e-6, rtol=1e-6), "f32 mismatch"

    # --- test 2: odd shape + bf16 (exercises lane-padding fallback) ------------
    x2 = jax.random.normal(k_x2, (3, 5, 7, 9), dtype=jnp.bfloat16)
    out2 = jax.block_until_ready(
        drop_path_pallas(x2, k_m2, drop_prob, True, force_pallas=True))
    ref2 = _reference(x2, k_m2, drop_prob)
    assert out2.shape == x2.shape and out2.dtype == x2.dtype
    assert jnp.allclose(out2.astype(jnp.float32), ref2.astype(jnp.float32),
                        atol=1e-2, rtol=1e-2), "bf16 mismatch"

    # --- test 3: multi-row samples -> >=2 grid steps + masked partial edge -----
    x3 = jax.random.normal(k_x3, (4, 8, 32, 48), dtype=jnp.float32)
    out3 = jax.block_until_ready(
        drop_path_pallas(x3, k_m3, drop_prob, True, force_pallas=True))
    ref3 = _reference(x3, k_m3, drop_prob)
    assert out3.shape == x3.shape and out3.dtype == x3.dtype
    assert jnp.allclose(out3, ref3, atol=1e-6, rtol=1e-6), "multi-row mismatch"

    # --- test 4: module call (tiny input -> fused XLA fast path) ---------------
    module = DropPath(drop_prob=drop_prob)
    module.training = True
    out4 = jax.block_until_ready(module(x1, k_m1))
    assert jnp.allclose(out4, ref1, atol=1e-6, rtol=1e-6), "fast-path mismatch"

    # --- eval / drop_prob=0 paths are identity ----------------------------------
    module.training = False
    assert jnp.array_equal(jax.block_until_ready(module(x1, k_m1)), x1)
    assert jnp.array_equal(
        jax.block_until_ready(drop_path_pallas(x1, k_m1, 0.0, True)), x1)

    print("KERNEL_OK")
</pallas_src>

<mosaic_0001>
module attributes {stable_mosaic.version = 11 : i64} {
  func.func @_drop_path_kernel(%arg0: i32, %arg1: memref<2x1xf32, #tpu.memory_space<vmem>>, %arg2: memref<2x1024xf32, #tpu.memory_space<vmem>>, %arg3: memref<2x1024xf32, #tpu.memory_space<vmem>>) attributes {dimension_semantics = [#tpu.dimension_semantics<parallel>], iteration_bounds = array<i64: 1>, scalar_prefetch = 0 : i64, scratch_operands = 0 : i64, tpu.core_type = #tpu.core_type<tc>, window_params = [{transform_indices = @transform_0, window_bounds = array<i64: 2, 1>}, {transform_indices = @transform_1, window_bounds = array<i64: 2, 1024>}, {transform_indices = @transform_2, window_bounds = array<i64: 2, 1024>}]} {
    %c0 = arith.constant 0 : index
    %c0_0 = arith.constant 0 : index
    %0 = vector.load %arg2[%c0, %c0_0] : memref<2x1024xf32, #tpu.memory_space<vmem>>, vector<2x1024xf32>
    %c0_1 = arith.constant 0 : index
    %c0_2 = arith.constant 0 : index
    %1 = vector.load %arg1[%c0_1, %c0_2] : memref<2x1xf32, #tpu.memory_space<vmem>>, vector<2x1xf32>
    %2 = vector.broadcast %1 : vector<2x1xf32> to vector<2x1024xf32>
    %3 = arith.mulf %0, %2 : vector<2x1024xf32>
    %c0_3 = arith.constant 0 : index
    %c0_4 = arith.constant 0 : index
    %4 = vector.load %arg3[%c0_3, %c0_4] : memref<2x1024xf32, #tpu.memory_space<vmem>>, vector<2x1024xf32>
    tpu.vector_store %arg3[%c0_3, %c0_4], %3 {strides = array<i32>} : memref<2x1024xf32, #tpu.memory_space<vmem>>, vector<2x1024xf32>,
    return
  }
  func.func @transform_0(%arg0: i32) -> (i32, i32) {
    %c0_i32 = arith.constant 0 : i32
    %c0_i32_0 = arith.constant 0 : i32
    return %arg0, %c0_i32 : i32, i32
  }
  func.func @transform_1(%arg0: i32) -> (i32, i32) {
    %c0_i32 = arith.constant 0 : i32
    %c0_i32_0 = arith.constant 0 : i32
    return %arg0, %c0_i32 : i32, i32
  }
  func.func @transform_2(%arg0: i32) -> (i32, i32) {
    %c0_i32 = arith.constant 0 : i32
    %c0_i32_0 = arith.constant 0 : i32
    return %arg0, %c0_i32 : i32, i32
  }
}

</mosaic_0001>

<bundles_post_ra>
// kernel: tpu_custom_call.1
= control target key start
LH: loop header
LB: loop body
LE: loop exit
PB: predicated region body
PF: predicated region fallthrough
CT: control target
= control target key end

     0   :  { %7 = vsyncpa [#allocation3], 0  ;;  %s157_s0 = inlined_call_operand.vmem [shape: f32[2,1], index: 0, kind: input, shape index: {}]   ;;  %s158_s1 = inlined_call_operand.hbm [shape: f32[2,1024], index: 1, kind: input, shape index: {}]   ;;  %s159_s2 = inlined_call_operand.hbm [shape: f32[2,1024], index: 2, kind: output, shape index: {}]  }
   0x1   :  { %8 = vsyncpa [#allocation4], 0  ;;  %s111_s9 = smov [#allocation2]   ;;  %s63_s13 = scalar_lea.hbm %s158_s1, 256 }
   0x2   :  { %s17_s10 = sshll.u32 %s111_s9, 4  ;;  %p64_p0 = scmp.ne.s32.totalorder %s158_s1, %s63_s13  ;;  %s18_s10 = int_to_ptr.vmem [resolvable:$true] %s17_s10 }
   0x3   :  { %p67_p1 = scmp.lt.u32.totalorder %s63_s13, %s158_s1 }
   0x5   :  { %p69_p2 = pnand %p67_p1, %p64_p0 }
   0x7   :  { %72 = shalt.err (!%p69_p2)
}
   0x8   :  { %s73_s18 = scalar_lea.vmem %s18_s10, 256  ;;  %p78_p4 = scmp.lt.s32.totalorder %s18_s10, %s18_s10 }
   0x9   :  { %p74_p3 = scmp.ne.s32.totalorder %s18_s10, %s73_s18  ;;  %p79_p5 = scmp.lt.s32.totalorder %s73_s18, %s73_s18 }
   0xb   :  { %p80_p6 = por %p79_p5, %p78_p4 }
   0xd   :  { %p81_p7 = pnand %p80_p6, %p74_p3 }
   0xf   :  { %84 = shalt.err (!%p81_p7)
}
  0x10   :  { %20 = dma.hbm_to_vmem [thread:$0]  %s158_s1, 256, %s18_s10, [#allocation3]  }
  0x11   :  { %107 = dma.done.wait [#allocation3], 256  }
  0x12   :  { %108 = vsyncadd [#allocation3], 4294967040  ;;  %v112_v0 = vmov 0   ;;  %v26_v1 = vld [vmem:[%s157_s0] sm:$0x3]  ;;  %v34_v4 = vlaneseq  ;;  %v25_v10 = vld [vmem:[#allocation2 + $0x8] sm:$0xff] }
  0x13   :  { %62 = vset.pattern.permute.xlu0 %v112_v0  ;;  %v113_v2 = vmov 269488144   ;;  %v24_v9 = vld [vmem:[#allocation2] sm:$0xff]  ;;  %s114_s23 = smov [#allocation5]  }
  0x14   :  { %29 = vperm.xlu0 %62, %v26_v1   ;;  %v32_v3 = vunpack.c.l.s4 %v113_v2  ;;  %v35_v6 = vshrl.u32 %v34_v4, 7  ;;  %s49_s1 = sshll.u32 %s114_s23, 4  ;;  %s50_s1 = int_to_ptr.vmem [resolvable:$true] %s49_s1 }
  0x15   :  { %s85_s24 = scalar_lea.vmem %s50_s1, 256  ;;  %p90_p9 = scmp.lt.s32.totalorder %s50_s1, %s50_s1 }
  0x16   :  { %v33_v5 = vunpack.c.0.s8 %v32_v3  ;;  %p86_p8 = scmp.ne.s32.totalorder %s50_s1, %s85_s24  ;;  %p91_p10 = scmp.lt.s32.totalorder %s85_s24, %s85_s24 }
  0x18   :  { %v36_v7 = vsub.s32 %v33_v5, %v35_v6  ;;  %p92_p11 = por %p91_p10, %p90_p9 }
  0x1a   :  { %p93_p12 = pnand %p92_p11, %p86_p8 }
  0x93   :  { %v30_v8 = vpop.permute.xlu0 %29 }
  0x94   :  { %v37_v11 = vrot.slane %v30_v8, %v36_v7 }
  0x96   :  { %v39_v12 = vmul.f32 %v37_v11, %v24_v9  ;;  %v40_v13 = vmul.f32 %v37_v11, %v25_v10 }
  0x98   :  { %41 = vst [vmem:[#allocation5] sm:$0xff] %v39_v12  ;;  %42 = vst [vmem:[#allocation5 + $0x8] sm:$0xff] %v40_v13 }
  0x99   :  { %96 = shalt.err (!%p93_p12)
}
  0x9a   :  { %s97_s26 = scalar_lea.hbm %s159_s2, 256 }
  0x9b   :  { %p98_p13 = scmp.ne.s32.totalorder %s159_s2, %s97_s26  ;;  %p101_p0 = scmp.lt.u32.totalorder %s97_s26, %s159_s2 }
  0x9d   :  { %p103_p1 = pnand %p101_p0, %p98_p13 }
  0x9f   :  { %106 = shalt.err (!%p103_p1)
}
  0xa0   :  { %52 = dma.vmem_to_hbm [thread:$0]  %s50_s1, 256, %s159_s2, [#allocation4]  }
  0xa1   :  { %109 = dma.done.wait [#allocation4], 256  }
  0xa2   :  { %110 = vsyncadd [#allocation4], 4294967040 }
  0xa3   :  { %56 = vsyncpa [#allocation3], 1 }
  0xa4   :  { %57 = vsyncpa [#allocation4], 1 }

</bundles_post_ra>
